<compile_context>
chip_gen: v7x
topology: tpu7x:2x2x1
jax: 0.10.0
libtpu: 0.0.40
codegen_flags: <defaults>
</compile_context>

<pallas_src>
import functools

import jax
import jax.numpy as jnp
from jax.experimental import pallas as pl
from jax.experimental.pallas import tpu as pltpu


# ----------------------------- Pallas kernel ------------------------------ #
def chembert_ic50_kernel(
    x_ref,       # (B*S, H)        embedded tokens, batch folded into rows
    bias_ref,    # (B*S, B*S)      additive attention bias (0 / -1e9)
    w_ref,       # (H, 512)        packed weight slab (128-aligned sections)
    v_ref,       # (1, 1152)       packed bias/LN/pool-vector slab
    o_ref,       # (B, H)          pooled context vectors
    *, B, S, H, nh, FF, woff, voff,
):
    hd = H // nh
    scale = 1.0 / (hd ** 0.5)

    x = x_ref[...]                                    # [BS, H]
    bias = bias_ref[...]                              # [BS, BS]

    # --- static, 128-aligned slices of the two parameter slabs -------------- #
    wqkv = w_ref[:, woff[0]:woff[0] + 3 * H]          # [H, 3H]
    wo   = w_ref[:, woff[1]:woff[1] + H]              # [H, H]  (= nh*hd, H)
    w1   = w_ref[:, woff[2]:woff[2] + FF]             # [H, FF]
    w2t  = w_ref[:, woff[3]:woff[3] + FF]             # [H, FF] (= w2.T)

    def vec(i, n):
        return v_ref[:, voff[i]:voff[i] + n]          # (1, n)

    bqkv = vec(0, 3 * H); bo = vec(1, H)
    ln1g = vec(2, H); ln1b = vec(3, H)
    b1 = vec(4, FF); b2 = vec(5, H)
    ln2g = vec(6, H); ln2b = vec(7, H)
    pool_w = vec(8, H)

    def layernorm(v, g, b):
        mu = jnp.mean(v, axis=-1, keepdims=True)
        var = jnp.mean((v - mu) ** 2, axis=-1, keepdims=True)
        return (v - mu) * jax.lax.rsqrt(var + 1e-12) * g + b

    # --- fused QKV projection: one lane-dense matmul ------------------------ #
    qkv = jnp.dot(x, wqkv, preferred_element_type=jnp.float32) + bqkv   # [BS, 3H]

    # --- per-head attention: static lane slices, no transposes -------------- #
    ctx_heads = []
    for h in range(nh):
        q = qkv[:, 0 * H + h * hd: 0 * H + (h + 1) * hd]                # [BS, hd]
        k = qkv[:, 1 * H + h * hd: 1 * H + (h + 1) * hd]
        v = qkv[:, 2 * H + h * hd: 2 * H + (h + 1) * hd]
        # Q @ K^T without an explicit transpose (contract both last axes).
        s = jax.lax.dot_general(q, k, (((1,), (1,)), ((), ())),
                                preferred_element_type=jnp.float32)
        s = s * scale + bias                                            # [BS, BS]
        s = s - jnp.max(s, axis=-1, keepdims=True)
        p = jnp.exp(s)
        p = p * pl.reciprocal(jnp.sum(p, axis=-1, keepdims=True), approx=False)
        ctx_heads.append(jnp.dot(p, v, preferred_element_type=jnp.float32))
    ctx = jnp.concatenate(ctx_heads, axis=-1)                           # [BS, H]

    attn = jnp.dot(ctx, wo, preferred_element_type=jnp.float32) + bo
    h1 = layernorm(x + attn, ln1g, ln1b)

    # --- feed-forward -------------------------------------------------------- #
    ff = jnp.dot(h1, w1, preferred_element_type=jnp.float32) + b1
    ff = jax.nn.gelu(ff, approximate=True)
    ff = jax.lax.dot_general(ff, w2t, (((1,), (1,)), ((), ())),         # ff @ w2
                             preferred_element_type=jnp.float32) + b2
    h2 = layernorm(h1 + ff, ln2g, ln2b)                                 # [BS, H]

    # --- AttentionPooling (exact PyTorch semantics, pad positions NOT masked) #
    # Linear(H->1) as VPU multiply + lane reduction; pool bias folded away
    # (softmax is shift-invariant).
    pooled = []
    for b in range(B):
        hb = h2[b * S:(b + 1) * S, :]                                   # [S, H]
        logits = jnp.sum(hb * pool_w, axis=-1, keepdims=True)           # [S, 1]
        logits = logits - jnp.max(logits, axis=0, keepdims=True)
        e = jnp.exp(logits)
        wgt = e * pl.reciprocal(jnp.sum(e, axis=0, keepdims=True), approx=False)
        pooled.append(jnp.sum(wgt * hb, axis=0, keepdims=True))         # [1, H]
    o_ref[...] = jnp.concatenate(pooled, axis=0)                        # [B, H]


# --------------------------- parameter packing ------------------------------ #
def pack_lane_aligned(pieces):
    """Pack 2-D arrays (same row count) into one slab; each piece starts at a
    128-aligned lane offset.  Returns (slab, offsets)."""
    rows = pieces[0].shape[0]
    offsets, cols = [], 0
    for p in pieces:
        assert p.shape[0] == rows
        offsets.append(cols)
        cols += ((p.shape[1] + 127) // 128) * 128
    slab = jnp.zeros((rows, cols), jnp.float32)
    for p, o in zip(pieces, offsets):
        slab = slab.at[:, o:o + p.shape[1]].set(p.astype(jnp.float32))
    return slab, tuple(offsets)


# ------------------------------ wrapper ------------------------------------ #
def chembert_ic50_forward(input_ids, attention_mask, params):
    B, S = input_ids.shape
    H = params["tok_emb"].shape[1]
    nh = params["qkv_w"].shape[1]
    hd = params["qkv_w"].shape[3]
    FF = params["w1"].shape[1]

    # Glue (plain JAX): embedding lookup + positional embeddings.
    x = (params["tok_emb"][input_ids] + params["pos_emb"][None, :S, :]).astype(jnp.float32)
    x2d = x.reshape(B * S, H)

    # Additive attention bias for the folded [B*S, B*S] scores:
    # 0 for same-batch real keys, -1e9 for padding keys or cross-batch pairs.
    m = attention_mask.reshape(B * S).astype(jnp.float32)
    batch_id = jnp.arange(B * S, dtype=jnp.int32) // S
    same = batch_id[:, None] == batch_id[None, :]
    bias = jnp.where(same & (m[None, :] > 0.5), 0.0, -1e9).astype(jnp.float32)

    # Lane-dense packed parameter slabs (done once, outside the kernel).
    # wqkv column index = which*(nh*hd) + head*hd + d
    wqkv = params["qkv_w"].transpose(2, 0, 1, 3).reshape(H, 3 * H)
    wo = params["wo"].reshape(nh * hd, H)
    w2t = params["w2"].T                                        # (H, FF)
    w_slab, woff = pack_lane_aligned([wqkv, wo, params["w1"], w2t])

    bqkv = params["qkv_b"].reshape(1, 3 * H)
    pool_w = params["pool_w"].reshape(1, H)
    v_slab, voff = pack_lane_aligned([
        bqkv, params["bo"], params["ln1_g"], params["ln1_b"],
        params["b1"], params["b2"], params["ln2_g"], params["ln2_b"], pool_w])
    # pool_b intentionally dropped: softmax is invariant to a constant shift.

    kernel = functools.partial(
        chembert_ic50_kernel, B=B, S=S, H=H, nh=nh, FF=FF, woff=woff, voff=voff)

    # Single grid step (grid=()): whole arrays resident in VMEM, one kernel
    # invocation for the entire (folded) batch.
    out = pl.pallas_call(
        kernel,
        out_shape=jax.ShapeDtypeStruct((B, H), jnp.float32),
    )(x2d, bias, w_slab, v_slab)
    return out


# --------------------------- pure-JAX reference ----------------------------- #
def chembert_ic50_reference(input_ids, attention_mask, params):
    B, S = input_ids.shape
    nh = params["qkv_w"].shape[1]
    hd = params["qkv_w"].shape[3]

    x = params["tok_emb"][input_ids] + params["pos_emb"][None, :S, :]
    mask = attention_mask.astype(jnp.float32)[:, None, :]          # [B,1,S]
    neg = (mask - 1.0) * 1e9
    scale = 1.0 / (hd ** 0.5)

    def layernorm(v, g, b):
        mu = jnp.mean(v, axis=-1, keepdims=True)
        var = jnp.mean((v - mu) ** 2, axis=-1, keepdims=True)
        return (v - mu) * jax.lax.rsqrt(var + 1e-12) * g + b

    attn_out = jnp.zeros(x.shape, jnp.float32)
    for h in range(nh):
        q = x @ params["qkv_w"][0, h] + params["qkv_b"][0, h]
        k = x @ params["qkv_w"][1, h] + params["qkv_b"][1, h]
        v = x @ params["qkv_w"][2, h] + params["qkv_b"][2, h]
        s = jnp.einsum("bqd,bkd->bqk", q, k) * scale + neg
        p = jax.nn.softmax(s, axis=-1)
        ctx = jnp.einsum("bqk,bkd->bqd", p, v)
        attn_out = attn_out + ctx @ params["wo"][h]
    attn_out = attn_out + params["bo"]

    h1 = layernorm(x + attn_out, params["ln1_g"], params["ln1_b"])
    ff = jax.nn.gelu(h1 @ params["w1"] + params["b1"], approximate=True)
    ff = ff @ params["w2"] + params["b2"]
    h2 = layernorm(h1 + ff, params["ln2_g"], params["ln2_b"])       # [B,S,H]

    logits = h2 @ params["pool_w"] + params["pool_b"][0, 0]         # [B,S,1]
    w = jax.nn.softmax(logits, axis=1)
    return jnp.sum(w * h2, axis=1)                                  # [B,H]


# ------------------------------ param init ---------------------------------- #
def init_params(key, vocab=50, max_seq=16, H=32, nh=4, FF=64):
    hd = H // nh
    ks = jax.random.split(key, 12)
    r = lambda k, shape: (0.02 * jax.random.normal(k, shape)).astype(jnp.float32)
    return dict(
        tok_emb=r(ks[0], (vocab, H)),
        pos_emb=r(ks[1], (max_seq, H)),
        qkv_w=r(ks[2], (3, nh, H, hd)),
        qkv_b=r(ks[3], (3, nh, 1, hd)),
        wo=r(ks[4], (nh, hd, H)),
        bo=r(ks[5], (1, H)),
        ln1_g=jnp.ones((1, H), jnp.float32),
        ln1_b=jnp.zeros((1, H), jnp.float32),
        w1=r(ks[6], (H, FF)),
        b1=r(ks[7], (1, FF)),
        w2=r(ks[8], (FF, H)),
        b2=r(ks[9], (1, H)),
        ln2_g=jnp.ones((1, H), jnp.float32),
        ln2_b=jnp.zeros((1, H), jnp.float32),
        pool_w=r(ks[10], (H, 1)),
        pool_b=r(ks[11], (1, 1)),
    )


if __name__ == "__main__":
    B, S, H = 2, 8, 32
    key = jax.random.PRNGKey(0)
    kp, ki = jax.random.split(key)
    params = init_params(kp, vocab=50, max_seq=16, H=H, nh=4, FF=64)

    input_ids = jax.random.randint(ki, (B, S), 0, 50, dtype=jnp.int32)
    attention_mask = jnp.array(
        [[1, 1, 1, 1, 1, 1, 1, 1],
         [1, 1, 1, 1, 1, 1, 0, 0]], dtype=jnp.int32)

    out = chembert_ic50_forward(input_ids, attention_mask, params)
    out = jax.block_until_ready(out)

    ref = chembert_ic50_reference(input_ids, attention_mask, params)
    assert out.shape == (B, H)
    assert jnp.allclose(out, ref, atol=1e-3, rtol=1e-3), "mismatch vs JAX reference"
    print("KERNEL_OK")
</pallas_src>

<mosaic_0001>
module attributes {stable_mosaic.version = 11 : i64} {
  func.func @chembert_ic50_kernel(%arg0: memref<16x32xf32, #tpu.memory_space<vmem>>, %arg1: memref<16x16xf32, #tpu.memory_space<vmem>>, %arg2: memref<32x512xf32, #tpu.memory_space<vmem>>, %arg3: memref<1x1152xf32, #tpu.memory_space<vmem>>, %arg4: memref<2x32xf32, #tpu.memory_space<vmem>>) attributes {dimension_semantics = [], scalar_prefetch = 0 : i64, scratch_operands = 0 : i64, tpu.core_type = #tpu.core_type<tc>} {
    %c0 = arith.constant 0 : index
    %c0_0 = arith.constant 0 : index
    %0 = vector.load %arg0[%c0, %c0_0] : memref<16x32xf32, #tpu.memory_space<vmem>>, vector<16x32xf32>
    %c0_1 = arith.constant 0 : index
    %c0_2 = arith.constant 0 : index
    %1 = vector.load %arg1[%c0_1, %c0_2] : memref<16x16xf32, #tpu.memory_space<vmem>>, vector<16x16xf32>
    %c0_3 = arith.constant 0 : index
    %c0_4 = arith.constant 0 : index
    %2 = vector.load %arg2[%c0_3, %c0_4] : memref<32x512xf32, #tpu.memory_space<vmem>>, vector<32x96xf32>
    %c0_5 = arith.constant 0 : index
    %c128 = arith.constant 128 : index
    %3 = vector.load %arg2[%c0_5, %c128] : memref<32x512xf32, #tpu.memory_space<vmem>>, vector<32x32xf32>
    %c0_6 = arith.constant 0 : index
    %c256 = arith.constant 256 : index
    %4 = vector.load %arg2[%c0_6, %c256] : memref<32x512xf32, #tpu.memory_space<vmem>>, vector<32x64xf32>
    %c0_7 = arith.constant 0 : index
    %c384 = arith.constant 384 : index
    %5 = vector.load %arg2[%c0_7, %c384] : memref<32x512xf32, #tpu.memory_space<vmem>>, vector<32x64xf32>
    %c0_8 = arith.constant 0 : index
    %c0_9 = arith.constant 0 : index
    %6 = vector.load %arg3[%c0_8, %c0_9] : memref<1x1152xf32, #tpu.memory_space<vmem>>, vector<1x96xf32>
    %c0_10 = arith.constant 0 : index
    %c128_11 = arith.constant 128 : index
    %7 = vector.load %arg3[%c0_10, %c128_11] : memref<1x1152xf32, #tpu.memory_space<vmem>>, vector<1x32xf32>
    %c0_12 = arith.constant 0 : index
    %c256_13 = arith.constant 256 : index
    %8 = vector.load %arg3[%c0_12, %c256_13] : memref<1x1152xf32, #tpu.memory_space<vmem>>, vector<1x32xf32>
    %c0_14 = arith.constant 0 : index
    %c384_15 = arith.constant 384 : index
    %9 = vector.load %arg3[%c0_14, %c384_15] : memref<1x1152xf32, #tpu.memory_space<vmem>>, vector<1x32xf32>
    %c0_16 = arith.constant 0 : index
    %c512 = arith.constant 512 : index
    %10 = vector.load %arg3[%c0_16, %c512] : memref<1x1152xf32, #tpu.memory_space<vmem>>, vector<1x64xf32>
    %c0_17 = arith.constant 0 : index
    %c640 = arith.constant 640 : index
    %11 = vector.load %arg3[%c0_17, %c640] : memref<1x1152xf32, #tpu.memory_space<vmem>>, vector<1x32xf32>
    %c0_18 = arith.constant 0 : index
    %c768 = arith.constant 768 : index
    %12 = vector.load %arg3[%c0_18, %c768] : memref<1x1152xf32, #tpu.memory_space<vmem>>, vector<1x32xf32>
    %c0_19 = arith.constant 0 : index
    %c896 = arith.constant 896 : index
    %13 = vector.load %arg3[%c0_19, %c896] : memref<1x1152xf32, #tpu.memory_space<vmem>>, vector<1x32xf32>
    %c0_20 = arith.constant 0 : index
    %c1024 = arith.constant 1024 : index
    %14 = vector.load %arg3[%c0_20, %c1024] : memref<1x1152xf32, #tpu.memory_space<vmem>>, vector<1x32xf32>
    %cst = arith.constant dense<0.000000e+00> : vector<16x96xf32>
    %15 = tpu.matmul %0, %2, %cst {dimension_numbers = #tpu.dot_dimension_numbers<[1], [0], [0], [1], [0, 0, 1, 1], [], []>} : vector<16x32xf32>, vector<32x96xf32>, vector<16x96xf32> -> vector<16x96xf32>
    %16 = vector.broadcast %6 : vector<1x96xf32> to vector<16x96xf32>
    %17 = arith.addf %15, %16 : vector<16x96xf32>
    %18 = vector.extract_strided_slice %17 {offsets = [0, 0], sizes = [16, 8], strides = [1, 1]} : vector<16x96xf32> to vector<16x8xf32>
    %19 = vector.extract_strided_slice %17 {offsets = [0, 32], sizes = [16, 8], strides = [1, 1]} : vector<16x96xf32> to vector<16x8xf32>
    %20 = vector.extract_strided_slice %17 {offsets = [0, 64], sizes = [16, 8], strides = [1, 1]} : vector<16x96xf32> to vector<16x8xf32>
    %cst_21 = arith.constant dense<0.000000e+00> : vector<16x16xf32>
    %21 = tpu.matmul %18, %19, %cst_21 {dimension_numbers = #tpu.dot_dimension_numbers<[1], [1], [0], [0], [0, 0, 1, 0], [], []>} : vector<16x8xf32>, vector<16x8xf32>, vector<16x16xf32> -> vector<16x16xf32>
    %cst_22 = arith.constant 0.353553385 : f32
    %22 = vector.broadcast %cst_22 : f32 to vector<16x16xf32>
    %23 = arith.mulf %21, %22 : vector<16x16xf32>
    %24 = arith.addf %23, %1 : vector<16x16xf32>
    %cst_23 = arith.constant dense<0xFF800000> : vector<16xf32>
    %25 = vector.multi_reduction <maximumf>, %24, %cst_23 [1] : vector<16x16xf32> to vector<16xf32>
    %26 = vector.shape_cast %25 : vector<16xf32> to vector<16x1xf32>
    %27 = vector.broadcast %26 : vector<16x1xf32> to vector<16x16xf32>
    %28 = arith.subf %24, %27 : vector<16x16xf32>
    %29 = math.exp %28 : vector<16x16xf32>
    %cst_24 = arith.constant dense<0.000000e+00> : vector<16xf32>
    %30 = vector.multi_reduction <add>, %29, %cst_24 [1] : vector<16x16xf32> to vector<16xf32>
    %31 = vector.shape_cast %30 : vector<16xf32> to vector<16x1xf32>
    %32 = tpu.reciprocal %31 : vector<16x1xf32> -> vector<16x1xf32>
    %33 = vector.broadcast %32 : vector<16x1xf32> to vector<16x16xf32>
    %34 = arith.mulf %29, %33 : vector<16x16xf32>
    %cst_25 = arith.constant dense<0.000000e+00> : vector<16x8xf32>
    %35 = tpu.matmul %34, %20, %cst_25 {dimension_numbers = #tpu.dot_dimension_numbers<[1], [0], [0], [1], [0, 0, 1, 1], [], []>} : vector<16x16xf32>, vector<16x8xf32>, vector<16x8xf32> -> vector<16x8xf32>
    %36 = vector.extract_strided_slice %17 {offsets = [0, 8], sizes = [16, 8], strides = [1, 1]} : vector<16x96xf32> to vector<16x8xf32>
    %37 = vector.extract_strided_slice %17 {offsets = [0, 40], sizes = [16, 8], strides = [1, 1]} : vector<16x96xf32> to vector<16x8xf32>
    %38 = vector.extract_strided_slice %17 {offsets = [0, 72], sizes = [16, 8], strides = [1, 1]} : vector<16x96xf32> to vector<16x8xf32>
    %cst_26 = arith.constant dense<0.000000e+00> : vector<16x16xf32>
    %39 = tpu.matmul %36, %37, %cst_26 {dimension_numbers = #tpu.dot_dimension_numbers<[1], [1], [0], [0], [0, 0, 1, 0], [], []>} : vector<16x8xf32>, vector<16x8xf32>, vector<16x16xf32> -> vector<16x16xf32>
    %cst_27 = arith.constant 0.353553385 : f32
    %40 = vector.broadcast %cst_27 : f32 to vector<16x16xf32>
    %41 = arith.mulf %39, %40 : vector<16x16xf32>
    %42 = arith.addf %41, %1 : vector<16x16xf32>
    %cst_28 = arith.constant dense<0xFF800000> : vector<16xf32>
    %43 = vector.multi_reduction <maximumf>, %42, %cst_28 [1] : vector<16x16xf32> to vector<16xf32>
    %44 = vector.shape_cast %43 : vector<16xf32> to vector<16x1xf32>
    %45 = vector.broadcast %44 : vector<16x1xf32> to vector<16x16xf32>
    %46 = arith.subf %42, %45 : vector<16x16xf32>
    %47 = math.exp %46 : vector<16x16xf32>
    %cst_29 = arith.constant dense<0.000000e+00> : vector<16xf32>
    %48 = vector.multi_reduction <add>, %47, %cst_29 [1] : vector<16x16xf32> to vector<16xf32>
    %49 = vector.shape_cast %48 : vector<16xf32> to vector<16x1xf32>
    %50 = tpu.reciprocal %49 : vector<16x1xf32> -> vector<16x1xf32>
    %51 = vector.broadcast %50 : vector<16x1xf32> to vector<16x16xf32>
    %52 = arith.mulf %47, %51 : vector<16x16xf32>
    %cst_30 = arith.constant dense<0.000000e+00> : vector<16x8xf32>
    %53 = tpu.matmul %52, %38, %cst_30 {dimension_numbers = #tpu.dot_dimension_numbers<[1], [0], [0], [1], [0, 0, 1, 1], [], []>} : vector<16x16xf32>, vector<16x8xf32>, vector<16x8xf32> -> vector<16x8xf32>
    %54 = vector.extract_strided_slice %17 {offsets = [0, 16], sizes = [16, 8], strides = [1, 1]} : vector<16x96xf32> to vector<16x8xf32>
    %55 = vector.extract_strided_slice %17 {offsets = [0, 48], sizes = [16, 8], strides = [1, 1]} : vector<16x96xf32> to vector<16x8xf32>
    %56 = vector.extract_strided_slice %17 {offsets = [0, 80], sizes = [16, 8], strides = [1, 1]} : vector<16x96xf32> to vector<16x8xf32>
    %cst_31 = arith.constant dense<0.000000e+00> : vector<16x16xf32>
    %57 = tpu.matmul %54, %55, %cst_31 {dimension_numbers = #tpu.dot_dimension_numbers<[1], [1], [0], [0], [0, 0, 1, 0], [], []>} : vector<16x8xf32>, vector<16x8xf32>, vector<16x16xf32> -> vector<16x16xf32>
    %cst_32 = arith.constant 0.353553385 : f32
    %58 = vector.broadcast %cst_32 : f32 to vector<16x16xf32>
    %59 = arith.mulf %57, %58 : vector<16x16xf32>
    %60 = arith.addf %59, %1 : vector<16x16xf32>
    %cst_33 = arith.constant dense<0xFF800000> : vector<16xf32>
    %61 = vector.multi_reduction <maximumf>, %60, %cst_33 [1] : vector<16x16xf32> to vector<16xf32>
    %62 = vector.shape_cast %61 : vector<16xf32> to vector<16x1xf32>
    %63 = vector.broadcast %62 : vector<16x1xf32> to vector<16x16xf32>
    %64 = arith.subf %60, %63 : vector<16x16xf32>
    %65 = math.exp %64 : vector<16x16xf32>
    %cst_34 = arith.constant dense<0.000000e+00> : vector<16xf32>
    %66 = vector.multi_reduction <add>, %65, %cst_34 [1] : vector<16x16xf32> to vector<16xf32>
    %67 = vector.shape_cast %66 : vector<16xf32> to vector<16x1xf32>
    %68 = tpu.reciprocal %67 : vector<16x1xf32> -> vector<16x1xf32>
    %69 = vector.broadcast %68 : vector<16x1xf32> to vector<16x16xf32>
    %70 = arith.mulf %65, %69 : vector<16x16xf32>
    %cst_35 = arith.constant dense<0.000000e+00> : vector<16x8xf32>
    %71 = tpu.matmul %70, %56, %cst_35 {dimension_numbers = #tpu.dot_dimension_numbers<[1], [0], [0], [1], [0, 0, 1, 1], [], []>} : vector<16x16xf32>, vector<16x8xf32>, vector<16x8xf32> -> vector<16x8xf32>
    %72 = vector.extract_strided_slice %17 {offsets = [0, 24], sizes = [16, 8], strides = [1, 1]} : vector<16x96xf32> to vector<16x8xf32>
    %73 = vector.extract_strided_slice %17 {offsets = [0, 56], sizes = [16, 8], strides = [1, 1]} : vector<16x96xf32> to vector<16x8xf32>
    %74 = vector.extract_strided_slice %17 {offsets = [0, 88], sizes = [16, 8], strides = [1, 1]} : vector<16x96xf32> to vector<16x8xf32>
    %cst_36 = arith.constant dense<0.000000e+00> : vector<16x16xf32>
    %75 = tpu.matmul %72, %73, %cst_36 {dimension_numbers = #tpu.dot_dimension_numbers<[1], [1], [0], [0], [0, 0, 1, 0], [], []>} : vector<16x8xf32>, vector<16x8xf32>, vector<16x16xf32> -> vector<16x16xf32>
    %cst_37 = arith.constant 0.353553385 : f32
    %76 = vector.broadcast %cst_37 : f32 to vector<16x16xf32>
    %77 = arith.mulf %75, %76 : vector<16x16xf32>
    %78 = arith.addf %77, %1 : vector<16x16xf32>
    %cst_38 = arith.constant dense<0xFF800000> : vector<16xf32>
    %79 = vector.multi_reduction <maximumf>, %78, %cst_38 [1] : vector<16x16xf32> to vector<16xf32>
    %80 = vector.shape_cast %79 : vector<16xf32> to vector<16x1xf32>
    %81 = vector.broadcast %80 : vector<16x1xf32> to vector<16x16xf32>
    %82 = arith.subf %78, %81 : vector<16x16xf32>
    %83 = math.exp %82 : vector<16x16xf32>
    %cst_39 = arith.constant dense<0.000000e+00> : vector<16xf32>
    %84 = vector.multi_reduction <add>, %83, %cst_39 [1] : vector<16x16xf32> to vector<16xf32>
    %85 = vector.shape_cast %84 : vector<16xf32> to vector<16x1xf32>
    %86 = tpu.reciprocal %85 : vector<16x1xf32> -> vector<16x1xf32>
    %87 = vector.broadcast %86 : vector<16x1xf32> to vector<16x16xf32>
    %88 = arith.mulf %83, %87 : vector<16x16xf32>
    %cst_40 = arith.constant dense<0.000000e+00> : vector<16x8xf32>
    %89 = tpu.matmul %88, %74, %cst_40 {dimension_numbers = #tpu.dot_dimension_numbers<[1], [0], [0], [1], [0, 0, 1, 1], [], []>} : vector<16x16xf32>, vector<16x8xf32>, vector<16x8xf32> -> vector<16x8xf32>
    %90 = tpu.concatenate %35, %53, %71, %89 in 1 : vector<16x8xf32>, vector<16x8xf32>, vector<16x8xf32>, vector<16x8xf32> -> vector<16x32xf32>
    %cst_41 = arith.constant dense<0.000000e+00> : vector<16x32xf32>
    %91 = tpu.matmul %90, %3, %cst_41 {dimension_numbers = #tpu.dot_dimension_numbers<[1], [0], [0], [1], [0, 0, 1, 1], [], []>} : vector<16x32xf32>, vector<32x32xf32>, vector<16x32xf32> -> vector<16x32xf32>
    %92 = vector.broadcast %7 : vector<1x32xf32> to vector<16x32xf32>
    %93 = arith.addf %91, %92 : vector<16x32xf32>
    %94 = arith.addf %0, %93 : vector<16x32xf32>
    %cst_42 = arith.constant dense<0.000000e+00> : vector<16xf32>
    %95 = vector.multi_reduction <add>, %94, %cst_42 [1] : vector<16x32xf32> to vector<16xf32>
    %96 = vector.shape_cast %95 : vector<16xf32> to vector<16x1xf32>
    %cst_43 = arith.constant 3.200000e+01 : f32
    %97 = vector.broadcast %cst_43 : f32 to vector<16x1xf32>
    %98 = arith.divf %96, %97 : vector<16x1xf32>
    %99 = vector.broadcast %98 : vector<16x1xf32> to vector<16x32xf32>
    %100 = arith.subf %94, %99 : vector<16x32xf32>
    %101 = arith.mulf %100, %100 : vector<16x32xf32>
    %cst_44 = arith.constant dense<0.000000e+00> : vector<16xf32>
    %102 = vector.multi_reduction <add>, %101, %cst_44 [1] : vector<16x32xf32> to vector<16xf32>
    %103 = vector.shape_cast %102 : vector<16xf32> to vector<16x1xf32>
    %cst_45 = arith.constant 3.200000e+01 : f32
    %104 = vector.broadcast %cst_45 : f32 to vector<16x1xf32>
    %105 = arith.divf %103, %104 : vector<16x1xf32>
    %106 = vector.broadcast %98 : vector<16x1xf32> to vector<16x32xf32>
    %107 = arith.subf %94, %106 : vector<16x32xf32>
    %cst_46 = arith.constant 9.99999996E-13 : f32
    %108 = vector.broadcast %cst_46 : f32 to vector<16x1xf32>
    %109 = arith.addf %105, %108 : vector<16x1xf32>
    %110 = math.rsqrt %109 : vector<16x1xf32>
    %111 = vector.broadcast %110 : vector<16x1xf32> to vector<16x32xf32>
    %112 = arith.mulf %107, %111 : vector<16x32xf32>
    %113 = vector.broadcast %8 : vector<1x32xf32> to vector<16x32xf32>
    %114 = arith.mulf %112, %113 : vector<16x32xf32>
    %115 = vector.broadcast %9 : vector<1x32xf32> to vector<16x32xf32>
    %116 = arith.addf %114, %115 : vector<16x32xf32>
    %cst_47 = arith.constant dense<0.000000e+00> : vector<16x64xf32>
    %117 = tpu.matmul %116, %4, %cst_47 {dimension_numbers = #tpu.dot_dimension_numbers<[1], [0], [0], [1], [0, 0, 1, 1], [], []>} : vector<16x32xf32>, vector<32x64xf32>, vector<16x64xf32> -> vector<16x64xf32>
    %118 = vector.broadcast %10 : vector<1x64xf32> to vector<16x64xf32>
    %119 = arith.addf %117, %118 : vector<16x64xf32>
    %120 = arith.mulf %119, %119 : vector<16x64xf32>
    %121 = arith.mulf %119, %120 : vector<16x64xf32>
    %cst_48 = arith.constant 4.471500e-02 : f32
    %122 = vector.broadcast %cst_48 : f32 to vector<16x64xf32>
    %123 = arith.mulf %122, %121 : vector<16x64xf32>
    %124 = arith.addf %119, %123 : vector<16x64xf32>
    %cst_49 = arith.constant 0.797884583 : f32
    %125 = vector.broadcast %cst_49 : f32 to vector<16x64xf32>
    %126 = arith.mulf %125, %124 : vector<16x64xf32>
    %127 = math.tanh %126 : vector<16x64xf32>
    %cst_50 = arith.constant 1.000000e+00 : f32
    %128 = vector.broadcast %cst_50 : f32 to vector<16x64xf32>
    %129 = arith.addf %128, %127 : vector<16x64xf32>
    %cst_51 = arith.constant 5.000000e-01 : f32
    %130 = vector.broadcast %cst_51 : f32 to vector<16x64xf32>
    %131 = arith.mulf %130, %129 : vector<16x64xf32>
    %132 = arith.mulf %119, %131 : vector<16x64xf32>
    %cst_52 = arith.constant dense<0.000000e+00> : vector<16x32xf32>
    %133 = tpu.matmul %132, %5, %cst_52 {dimension_numbers = #tpu.dot_dimension_numbers<[1], [1], [0], [0], [0, 0, 1, 0], [], []>} : vector<16x64xf32>, vector<32x64xf32>, vector<16x32xf32> -> vector<16x32xf32>
    %134 = vector.broadcast %11 : vector<1x32xf32> to vector<16x32xf32>
    %135 = arith.addf %133, %134 : vector<16x32xf32>
    %136 = arith.addf %116, %135 : vector<16x32xf32>
    %cst_53 = arith.constant dense<0.000000e+00> : vector<16xf32>
    %137 = vector.multi_reduction <add>, %136, %cst_53 [1] : vector<16x32xf32> to vector<16xf32>
    %138 = vector.shape_cast %137 : vector<16xf32> to vector<16x1xf32>
    %cst_54 = arith.constant 3.200000e+01 : f32
    %139 = vector.broadcast %cst_54 : f32 to vector<16x1xf32>
    %140 = arith.divf %138, %139 : vector<16x1xf32>
    %141 = vector.broadcast %140 : vector<16x1xf32> to vector<16x32xf32>
    %142 = arith.subf %136, %141 : vector<16x32xf32>
    %143 = arith.mulf %142, %142 : vector<16x32xf32>
    %cst_55 = arith.constant dense<0.000000e+00> : vector<16xf32>
    %144 = vector.multi_reduction <add>, %143, %cst_55 [1] : vector<16x32xf32> to vector<16xf32>
    %145 = vector.shape_cast %144 : vector<16xf32> to vector<16x1xf32>
    %cst_56 = arith.constant 3.200000e+01 : f32
    %146 = vector.broadcast %cst_56 : f32 to vector<16x1xf32>
    %147 = arith.divf %145, %146 : vector<16x1xf32>
    %148 = vector.broadcast %140 : vector<16x1xf32> to vector<16x32xf32>
    %149 = arith.subf %136, %148 : vector<16x32xf32>
    %cst_57 = arith.constant 9.99999996E-13 : f32
    %150 = vector.broadcast %cst_57 : f32 to vector<16x1xf32>
    %151 = arith.addf %147, %150 : vector<16x1xf32>
    %152 = math.rsqrt %151 : vector<16x1xf32>
    %153 = vector.broadcast %152 : vector<16x1xf32> to vector<16x32xf32>
    %154 = arith.mulf %149, %153 : vector<16x32xf32>
    %155 = vector.broadcast %12 : vector<1x32xf32> to vector<16x32xf32>
    %156 = arith.mulf %154, %155 : vector<16x32xf32>
    %157 = vector.broadcast %13 : vector<1x32xf32> to vector<16x32xf32>
    %158 = arith.addf %156, %157 : vector<16x32xf32>
    %159 = vector.extract_strided_slice %158 {offsets = [0, 0], sizes = [8, 32], strides = [1, 1]} : vector<16x32xf32> to vector<8x32xf32>
    %160 = vector.broadcast %14 : vector<1x32xf32> to vector<8x32xf32>
    %161 = arith.mulf %159, %160 : vector<8x32xf32>
    %cst_58 = arith.constant dense<0.000000e+00> : vector<8xf32>
    %162 = vector.multi_reduction <add>, %161, %cst_58 [1] : vector<8x32xf32> to vector<8xf32>
    %163 = vector.shape_cast %162 : vector<8xf32> to vector<8x1xf32>
    %cst_59 = arith.constant dense<0xFF800000> : vector<1xf32>
    %164 = vector.multi_reduction <maximumf>, %163, %cst_59 [0] : vector<8x1xf32> to vector<1xf32>
    %165 = vector.shape_cast %164 : vector<1xf32> to vector<1x1xf32>
    %166 = vector.broadcast %165 : vector<1x1xf32> to vector<8x1xf32>
    %167 = arith.subf %163, %166 : vector<8x1xf32>
    %168 = math.exp %167 : vector<8x1xf32>
    %cst_60 = arith.constant dense<0.000000e+00> : vector<1xf32>
    %169 = vector.multi_reduction <add>, %168, %cst_60 [0] : vector<8x1xf32> to vector<1xf32>
    %170 = vector.shape_cast %169 : vector<1xf32> to vector<1x1xf32>
    %171 = tpu.reciprocal %170 : vector<1x1xf32> -> vector<1x1xf32>
    %172 = vector.broadcast %171 : vector<1x1xf32> to vector<8x1xf32>
    %173 = arith.mulf %168, %172 : vector<8x1xf32>
    %174 = vector.broadcast %173 : vector<8x1xf32> to vector<8x32xf32>
    %175 = arith.mulf %174, %159 : vector<8x32xf32>
    %cst_61 = arith.constant dense<0.000000e+00> : vector<32xf32>
    %176 = vector.multi_reduction <add>, %175, %cst_61 [0] : vector<8x32xf32> to vector<32xf32>
    %177 = vector.shape_cast %176 : vector<32xf32> to vector<1x32xf32>
    %178 = vector.extract_strided_slice %158 {offsets = [8, 0], sizes = [8, 32], strides = [1, 1]} : vector<16x32xf32> to vector<8x32xf32>
    %179 = vector.broadcast %14 : vector<1x32xf32> to vector<8x32xf32>
    %180 = arith.mulf %178, %179 : vector<8x32xf32>
    %cst_62 = arith.constant dense<0.000000e+00> : vector<8xf32>
    %181 = vector.multi_reduction <add>, %180, %cst_62 [1] : vector<8x32xf32> to vector<8xf32>
    %182 = vector.shape_cast %181 : vector<8xf32> to vector<8x1xf32>
    %cst_63 = arith.constant dense<0xFF800000> : vector<1xf32>
    %183 = vector.multi_reduction <maximumf>, %182, %cst_63 [0] : vector<8x1xf32> to vector<1xf32>
    %184 = vector.shape_cast %183 : vector<1xf32> to vector<1x1xf32>
    %185 = vector.broadcast %184 : vector<1x1xf32> to vector<8x1xf32>
    %186 = arith.subf %182, %185 : vector<8x1xf32>
    %187 = math.exp %186 : vector<8x1xf32>
    %cst_64 = arith.constant dense<0.000000e+00> : vector<1xf32>
    %188 = vector.multi_reduction <add>, %187, %cst_64 [0] : vector<8x1xf32> to vector<1xf32>
    %189 = vector.shape_cast %188 : vector<1xf32> to vector<1x1xf32>
    %190 = tpu.reciprocal %189 : vector<1x1xf32> -> vector<1x1xf32>
    %191 = vector.broadcast %190 : vector<1x1xf32> to vector<8x1xf32>
    %192 = arith.mulf %187, %191 : vector<8x1xf32>
    %193 = vector.broadcast %192 : vector<8x1xf32> to vector<8x32xf32>
    %194 = arith.mulf %193, %178 : vector<8x32xf32>
    %cst_65 = arith.constant dense<0.000000e+00> : vector<32xf32>
    %195 = vector.multi_reduction <add>, %194, %cst_65 [0] : vector<8x32xf32> to vector<32xf32>
    %196 = vector.shape_cast %195 : vector<32xf32> to vector<1x32xf32>
    %197 = tpu.concatenate %177, %196 in 0 : vector<1x32xf32>, vector<1x32xf32> -> vector<2x32xf32>
    %c0_66 = arith.constant 0 : index
    %c0_67 = arith.constant 0 : index
    %198 = vector.load %arg4[%c0_66, %c0_67] : memref<2x32xf32, #tpu.memory_space<vmem>>, vector<2x32xf32>
    tpu.vector_store %arg4[%c0_66, %c0_67], %197 {strides = array<i32>} : memref<2x32xf32, #tpu.memory_space<vmem>>, vector<2x32xf32>,
    return
  }
}

</mosaic_0001>

<bundles_post_ra>
// kernel: tpu_custom_call.1
= control target key start
LH: loop header
LB: loop body
LE: loop exit
PB: predicated region body
PF: predicated region fallthrough
CT: control target
= control target key end

     0   :  { %9 = vsyncpa [#allocation3], 0  ;;  %s2240_s0 = inlined_call_operand.hbm [shape: f32[16,32], index: 0, kind: input, shape index: {}]   ;;  %s2241_s1 = inlined_call_operand.hbm [shape: f32[16,16], index: 1, kind: input, shape index: {}]   ;;  %s2242_s2 = inlined_call_operand.hbm [shape: f32[32,512], index: 2, kind: input, shape index: {}]   ;;  %s2243_s3 = inlined_call_operand.vmem [shape: f32[1,1152], index: 3, kind: input, shape index: {}]   ;;  %s2244_s4 = inlined_call_operand.hbm [shape: f32[2,32], index: 4, kind: output, shape index: {}]  }
   0x1   :  { %10 = vsyncpa [#allocation6], 0 }
   0x2   :  { %11 = vsyncpa [#allocation4], 0  ;;  %s1972_s15 = smov [#allocation5]   ;;  %s1973_s17 = smov [#allocation2]  }
   0x3   :  { %s29_s16 = sshll.u32 %s1972_s15, 4  ;;  %s17_s18 = sshll.u32 %s1973_s17, 4  ;;  %s30_s16 = int_to_ptr.vmem [resolvable:$true] %s29_s16  ;;  %s2018_s18 = int_to_ptr.vmem [resolvable:$true] %s17_s18 }
   0x4   :  { %s1878_s21 = scalar_lea.hbm %s2241_s1, 256 }
   0x5   :  { %p1879_p0 = scmp.ne.s32.totalorder %s2241_s1, %s1878_s21  ;;  %p1882_p1 = scmp.lt.u32.totalorder %s1878_s21, %s2241_s1 }
   0x7   :  { %p1884_p2 = pnand %p1882_p1, %p1879_p0 }
   0x9   :  { %1887 = shalt.err (!%p1884_p2)
}
   0xa   :  { %s1888_s26 = scalar_lea.vmem %s30_s16, 256  ;;  %p1893_p4 = scmp.lt.s32.totalorder %s30_s16, %s30_s16 }
   0xb   :  { %p1889_p3 = scmp.ne.s32.totalorder %s30_s16, %s1888_s26  ;;  %p1894_p5 = scmp.lt.s32.totalorder %s1888_s26, %s1888_s26 }
   0xd   :  { %p1895_p6 = por %p1894_p5, %p1893_p4 }
   0xf   :  { %p1896_p7 = pnand %p1895_p6, %p1889_p3 }
  0x11   :  { %1899 = shalt.err (!%p1896_p7)
}
  0x12   :  { %s1974_s27 = smov 128   ;;  %s1975_s28 = smov 8  }
  0x13   :  { %35 = dma.hbm_to_vmem [thread:$0]  %s2241_s1, 256, %s30_s16, [#allocation6], %s1974_s27, %s1974_s27, %s1975_s28  }
  0x14   :  { %s1900_s7 = scalar_lea.hbm %s2240_s0, 256 }
  0x15   :  { %p1901_p8 = scmp.ne.s32.totalorder %s2240_s0, %s1900_s7  ;;  %p1904_p9 = scmp.lt.u32.totalorder %s1900_s7, %s2240_s0 }
  0x17   :  { %p1906_p10 = pnand %p1904_p9, %p1901_p8 }
  0x19   :  { %1909 = shalt.err (!%p1906_p10)
}
  0x1a   :  { %s1910_s12 = scalar_lea.vmem %s2018_s18, 256  ;;  %p1915_p12 = scmp.lt.s32.totalorder %s2018_s18, %s2018_s18 }
  0x1b   :  { %p1911_p11 = scmp.ne.s32.totalorder %s2018_s18, %s1910_s12  ;;  %p1916_p13 = scmp.lt.s32.totalorder %s1910_s12, %s1910_s12 }
  0x1d   :  { %p1917_p0 = por %p1916_p13, %p1915_p12 }
  0x1f   :  { %p1918_p1 = pnand %p1917_p0, %p1911_p11 }
  0x21   :  { %1921 = shalt.err (!%p1918_p1)
}
  0x22   :  { %23 = dma.hbm_to_vmem [thread:$0]  %s2240_s0, 256, %s2018_s18, [#allocation3], %s1974_s27, %s1974_s27, %s1975_s28  }
  0x23   :  { %s1976_s14 = smov [#allocation7]   ;;  %s1922_s19 = scalar_lea.hbm %s2242_s2, 2048 }
  0x24   :  { %s41_s15 = sshll.u32 %s1976_s14, 4  ;;  %p1923_p2 = scmp.ne.s32.totalorder %s2242_s2, %s1922_s19  ;;  %s42_s15 = int_to_ptr.vmem [resolvable:$true] %s41_s15 }
  0x25   :  { %p1926_p3 = scmp.lt.u32.totalorder %s1922_s19, %s2242_s2 }
  0x27   :  { %p1928_p4 = pnand %p1926_p3, %p1923_p2 }
  0x29   :  { %1931 = shalt.err (!%p1928_p4)
}
  0x2a   :  { %s1932_s24 = scalar_lea.vmem %s42_s15, 2048  ;;  %p1937_p6 = scmp.lt.s32.totalorder %s42_s15, %s42_s15 }
  0x2b   :  { %p1933_p5 = scmp.ne.s32.totalorder %s42_s15, %s1932_s24  ;;  %p1938_p7 = scmp.lt.s32.totalorder %s1932_s24, %s1932_s24 }
  0x2d   :  { %p1939_p8 = por %p1938_p7, %p1937_p6 }
  0x2f   :  { %p1940_p9 = pnand %p1939_p8, %p1933_p5 }
  0x31   :  { %1943 = shalt.err (!%p1940_p9)
}
  0x32   :  { %s1977_s0 = smov 512   ;;  %s1978_s18 = smov 32  }
  0x33   :  { %47 = dma.hbm_to_vmem [thread:$0]  %s2242_s2, 2048, %s42_s15, [#allocation6], %s1977_s0, %s1977_s0, %s1978_s18  }
  0x34   :  { %1966 = dma.done.wait [#allocation3], 256  }
  0x35   :  { %1967 = vsyncadd [#allocation3], 4294967040 }
  0x36   :  { %1968 = dma.done.wait [#allocation6], 2304  }
  0x37   :  { %1969 = vsyncadd [#allocation6], 4294964992  ;;  %vm94_vm0 = vcmask 261120   ;;  %v63_v0 = vld [vmem:[#allocation7] sm:$0xff]  ;;  %v2067_v7 = vld [vmem:[#allocation2 + $0x8] sm:$0xff]  ;;  %vm182_vm1 = vcmask 64512  }
  0x38   :  { %v64_v1 = vld [vmem:[#allocation7 + $0x20] sm:$0xff]  ;;  %s1979_s29 = smov 120   ;;  %s1980_s30 = smov 96   ;;  %vm2090_vm2 = vmpackc.low %vm182_vm1, %vm182_vm1  ;;  %v2106_v26 = vld [vmem:[#allocation5 + $0x8] sm:$0xff]  ;;  %vm270_vm3 = vcmask 130048   ;;  %vm1020_vm4 = vcmask 195584  }
  0x39   :  { %v65_v2 = vld [vmem:[#allocation7 + $0x40] sm:$0xff]  ;;  %v1689_v3 = vpack.c.bf16 %v64_v1, %v63_v0  ;;  %s1981_s5 = smov 88   ;;  %v2108_v29 = vld [vmem:[#allocation5] sm:$0xff]  ;;  %s1982_s6 = smov 64   ;;  %vm1266_vm5 = vcmask 523264   ;;  %vm1468_vm7 = vcmask 1040384  }
  0x3a   :  { %v66_v4 = vld [vmem:[#allocation7 + $0x60] sm:$0xff]  ;;  %s1983_s7 = smov 80   ;;  %s1984_s8 = smov 56   ;;  %vm1754_vm6 = vmpackc.low %vm1266_vm5, %vm1266_vm5  ;;  %vm1470_vm8 = vcmask 254976  }
  0x3b   :  { %v2063_v5 = vld [vmem:[#allocation2] sm:$0xff]  ;;  %v1693_v6 = vpack.c.bf16 %v66_v4, %v65_v2  ;;  %1690 = vmatprep.subr.bf16.mxu1 %v1689_v3  ;;  %s1985_s9 = smov 112   ;;  %s1986_s10 = smov 72  }
  0x3c   :  { %1597 = vmatprep.mubr.msk.f32.mxu1 %vm94_vm0, %v2063_v5  ;;  %1692 = vmatpush3.bf16.msra.mxu1 %v1689_v3  ;;  %v1488_v8 = vld [vmem:[%s2243_s3] ss:$0 sm:$0xff]  ;;  %s1987_s11 = smov 104   ;;  %s1988_s12 = smov 48  }
  0x3d   :  { %1694 = vmatprep.subr.bf16.mxu1 %v1693_v6  ;;  %s1989_s1 = smov 40   ;;  %s1990_s13 = smov 16  }
  0x40   :  { %1696 = vmatpush3.bf16.msra.mxu1 %v1693_v6 }
  0x43   :  { %1598 = vmatmul.mubr.msk.f32.vlgmr.msra.gmra.mrb[0].mxu1 %vm94_vm0, %v2067_v7 }
 0x116   :  { %v1599_v9 = vpop.f32.mrb[0].mxu1 }
 0x117   :  { %v2074_v10 = vadd.f32 %v1599_v9, %v1488_v8  ;;  %v167_v11 = vpop.f32.mrb[1].mxu1 }
 0x118   :  { %v2076_v12 = vadd.f32 %v1488_v8, %v167_v11 }
 0x11a   :  { %380 = vrot.lane.b32.xlu1 %v2076_v12, %s1979_s29  ;;  %1604 = vmatprep.mubr.msk.f32.mxu1 %vm182_vm1, %v2076_v12  ;;  %v2083_v13 = vpack.i.bf16 %v2074_v10, %v2076_v12 }
 0x11c   :  { %1787 = vrot.lane.b32.xlu0 %v2083_v13, %s1980_s30 }
 0x11e   :  { %382 = vrot.lane.b32.xlu1 %v2074_v10, %s1979_s29 }
 0x120   :  { %1792 = vrot.lane.b32.xlu0 %v2083_v13, %s1981_s5 }
 0x18c   :  { %v381_v23 = vpop.permute.xlu1 %380 }
 0x18e   :  { %v1788_v14 = vpop.permute.xlu0 %1787 }
 0x18f   :  { %v1790_v15 = vunpack.i.h.bf16 %v1788_v14  ;;  %v1789_v16 = vunpack.i.l.bf16 %v1788_v14 }
 0x190   :  { %v383_v24 = vpop.permute.xlu1 %382 }
 0x191   :  { %v1697_v18 = vpack.c.bf16 %v1790_v15, %v1789_v16 }
 0x192   :  { %v1793_v19 = vpop.permute.xlu0 %1792 }
 0x193   :  { %v1795_v20 = vunpack.i.h.bf16 %v1793_v19  ;;  %v1794_v21 = vunpack.i.l.bf16 %v1793_v19  ;;  %1699 = vmatprep.subr.msk.bf16.mxu1 %vm2090_vm2, %v1697_v18 }
 0x194   :  { %1702 = vmatpush3.bf16.xpose.msk.msra.mxu1 %vm2090_vm2, %v1697_v18 }
 0x195   :  { %v1707_v22 = vpack.c.bf16 %v1795_v20, %v1794_v21 }
 0x197   :  { %1709 = vmatprep.subr.msk.bf16.mxu1 %vm2090_vm2, %v1707_v22 }
 0x19b   :  { %1605 = vmatmul.mubr.msk.f32.vlgmr.msra.gmra.mrb[2].mxu1 %vm182_vm1, %v2074_v10 }
 0x19c   :  { %1712 = vmatpush3.bf16.xpose.msk.msra.mxu1 %vm2090_vm2, %v1707_v22  ;;  %1618 = vmatprep.mubr.msk.f32.mxu1 %vm182_vm1, %v381_v23 }
 0x1a3   :  { %1619 = vmatmul.mubr.msk.f32.vlgmr.msra.gmra.mrb[4].mxu1 %vm182_vm1, %v383_v24 }
 0x26e   :  { %v1606_v25 = vpop.f32.mrb[2].mxu1 }
 0x26f   :  { %v267_v27 = vmul.f32 0.35355338, %v1606_v25  ;;  %v257_v28 = vpop.f32.mrb[3].mxu1 }
 0x270   :  { %v266_v30 = vmul.f32 0.35355338, %v257_v28 }
 0x271   :  { %v269_v31 = vadd.f32 %v267_v27, %v2106_v26 }
 0x272   :  { %v268_v32 = vadd.f32 %v266_v30, %v2108_v29 }
 0x273   :  { %v274_v33 = vsel %vm270_vm3, %v269_v31, -inf }
 0x274   :  { %275 = vmax.xlane.f32.xlu1 %v274_v33  ;;  %v271_v34 = vsel %vm270_vm3, %v268_v32, -inf }
 0x275   :  { %272 = vmax.xlane.f32.xlu0 %v271_v34 }
 0x276   :  { %v1620_v35 = vpop.f32.mrb[4].mxu1 }
 0x277   :  { %v462_v36 = vpop.f32.mrb[5].mxu1  ;;  %v472_v37 = vmul.f32 0.35355338, %v1620_v35 }
 0x278   :  { %v471_v38 = vmul.f32 0.35355338, %v462_v36 }
 0x279   :  { %v474_v41 = vadd.f32 %v472_v37, %v2106_v26 }
 0x27a   :  { %v473_v39 = vadd.f32 %v471_v38, %v2108_v29 }
 0x27b   :  { %v478_v42 = vsel %vm270_vm3, %v474_v41, -inf }
 0x27c   :  { %v475_v40 = vsel %vm270_vm3, %v473_v39, -inf }
 0x27d   :  { %476 = vmax.xlane.f32.xlu0 %v475_v40 }
 0x281   :  { %479 = vmax.xlane.f32.xlu0 %v478_v42 }
 0x285   :  { %1797 = vrot.lane.b32.xlu1 %v2083_v13, %s1982_s6 }
 0x301   :  { %v276_v43 = vpop.xlane.xlu1 %275 }
 0x302   :  { %v278_v44 = vsub.f32 %v269_v31, %v276_v43  ;;  %v273_v45 = vpop.xlane.xlu0 %272 }
 0x303   :  { %v277_v46 = vsub.f32 %v268_v32, %v273_v45 }
 0x304   :  { %v281_v47 = vmul.f32 1.442695, %v278_v44 }
 0x305   :  { %v279_v48 = vmul.f32 1.442695, %v277_v46  ;;  %v1798_v49 = vpop.permute.xlu1 %1797 }
 0x306   :  { %1826 = vpow2.f32 %v281_v47  ;;  %v1800_v50 = vunpack.i.h.bf16 %v1798_v49  ;;  %v1799_v51 = vunpack.i.l.bf16 %v1798_v49 }
 0x307   :  { %1828 = vpow2.f32 %v279_v48 }
 0x308   :  { %v1703_v52 = vpack.c.bf16 %v1800_v50, %v1799_v51 }
 0x30a   :  { %1704 = vmatprep.subr.bf16.mxu0 %v1703_v52  ;;  %v477_v53 = vpop.xlane.xlu0 %476 }
 0x30b   :  { %1706 = vmatpush3.bf16.msra.mxu0 %v1703_v52  ;;  %v481_v63 = vsub.f32 %v473_v39, %v477_v53 }
 0x30d   :  { %v483_v0 = vmul.f32 1.442695, %v481_v63 }
 0x30e   :  { %v480_v54 = vpop.xlane.xlu0 %479 }
 0x30f   :  { %v482_v55 = vsub.f32 %v474_v41, %v480_v54 }
 0x310   :  { %v1827_v56 = vpop.eup %1826 }
 0x311   :  { %v1829_v57 = vpop.eup %1828  ;;  %v485_v58 = vmul.f32 1.442695, %v482_v55  ;;  %v286_v59 = vsel %vm270_vm3, %v1827_v56, 0.0 }
 0x312   :  { %287 = vadd.xlane.f32.xlu0 %v286_v59  ;;  %v283_v60 = vsel %vm270_vm3, %v1829_v57, 0.0 }
 0x313   :  { %1830 = vpow2.f32 %v485_v58  ;;  %284 = vadd.xlane.f32.xlu1 %v283_v60 }
 0x314   :  { %1832 = vpow2.f32 %v483_v0 }
 0x31d   :  { %v1831_v61 = vpop.eup %1830 }
 0x31e   :  { %v490_v62 = vsel %vm270_vm3, %v1831_v61, 0.0  ;;  %v1833_v1 = vpop.eup %1832 }
 0x31f   :  { %491 = vadd.xlane.f32.xlu0 %v490_v62  ;;  %v487_v2 = vsel %vm270_vm3, %v1833_v1, 0.0 }
 0x324   :  { %1807 = vrot.lane.b32.xlu1 %v2083_v13, %s1983_s7 }
 0x335   :  { %1802 = vrot.lane.b32.xlu0 %v2083_v13, %s1984_s8 }
 0x339   :  { %586 = vrot.lane.b32.xlu0 %v2074_v10, %s1985_s9 }
 0x348   :  { %488 = vadd.xlane.f32.xlu1 %v487_v2 }
 0x359   :  { %584 = vrot.lane.b32.xlu1 %v2076_v12, %s1985_s9 }
 0x39f   :  { %v288_v3 = vpop.xlane.xlu0 %287 }
 0x3a0   :  { %1834 = vrcp.f32 %v288_v3  ;;  %v285_v4 = vpop.xlane.xlu1 %284 }
 0x3a1   :  { %1836 = vrcp.f32 %v285_v4 }
 0x3a4   :  { %v1808_v15 = vpop.permute.xlu1 %1807 }
 0x3a5   :  { %v1810_v18 = vunpack.i.h.bf16 %v1808_v15  ;;  %v1809_v19 = vunpack.i.l.bf16 %v1808_v15 }
 0x3a7   :  { %v1717_v23 = vpack.c.bf16 %v1810_v18, %v1809_v19 }
 0x3aa   :  { %v1835_v6 = vpop.eup %1834 }
 0x3ab   :  { %v1837_v8 = vpop.eup %1836  ;;  %v292_v14 = vmul.f32 %v1835_v6, %v1827_v56 }
 0x3ac   :  { %v492_v9 = vpop.xlane.xlu0 %491  ;;  %v291_v11 = vmul.f32 %v1837_v8, %v1829_v57 }
 0x3ad   :  { %1838 = vrcp.f32 %v492_v9 }
 0x3ae   :  { %1611 = vmatprep.mubr.msk.f32.mxu0 %vm270_vm3, %v291_v11 }
 0x3af   :  { %1612 = vmatmul.mubr.msk.f32.vlgmr.msra.gmra.mrb[0].mxu0 %vm270_vm3, %v292_v14 }
 0x3b0   :  { %v1803_v16 = vpop.permute.xlu0 %1802 }
 0x3b1   :  { %v1805_v20 = vunpack.i.h.bf16 %v1803_v16  ;;  %v1804_v21 = vunpack.i.l.bf16 %v1803_v16 }
 0x3b3   :  { %v1713_v22 = vpack.c.bf16 %v1805_v20, %v1804_v21 }
 0x3b4   :  { %v587_v32 = vpop.permute.xlu0 %586 }
 0x3b5   :  { %1714 = vmatprep.subr.bf16.mxu0 %v1713_v22 }
 0x3b6   :  { %1716 = vmatpush3.bf16.msra.mxu0 %v1713_v22 }
 0x3b7   :  { %1719 = vmatprep.subr.msk.bf16.mxu0 %vm2090_vm2, %v1717_v23  ;;  %v1839_v25 = vpop.eup %1838 }
 0x3b8   :  { %v496_v30 = vmul.f32 %v1839_v25, %v1831_v61 }
 0x3d5   :  { %v489_v24 = vpop.xlane.xlu1 %488 }
 0x3d6   :  { %1840 = vrcp.f32 %v489_v24 }
 0x3d9   :  { %v585_v31 = vpop.permute.xlu1 %584 }
 0x3e0   :  { %v1841_v27 = vpop.eup %1840 }
 0x3e1   :  { %v495_v28 = vmul.f32 %v1841_v27, %v1833_v1 }
 0x3e3   :  { %1625 = vmatprep.mubr.msk.f32.mxu0 %vm270_vm3, %v495_v28 }
 0x3e4   :  { %1626 = vmatmul.mubr.msk.f32.vlgmr.msra.gmra.mrb[2].mxu0 %vm270_vm3, %v496_v30 }
 0x3e5   :  { %1722 = vmatpush3.bf16.xpose.msk.msra.mxu0 %vm2090_vm2, %v1717_v23  ;;  %1632 = vmatprep.mubr.msk.f32.mxu0 %vm182_vm1, %v585_v31 }
 0x3ec   :  { %1633 = vmatmul.mubr.msk.f32.vlgmr.msra.gmra.mrb[4].mxu0 %vm182_vm1, %v587_v32 }
 0x482   :  { %v2137_v33 = vpop.f32.mrb[0].mxu0 }
 0x483   :  { %v2139_v34 = vpop.f32.mrb[1].mxu0 }
 0x4b7   :  { %v2141_v35 = vpop.f32.mrb[2].mxu0 }
 0x4b8   :  { %v2143_v36 = vpop.f32.mrb[3].mxu0 }
 0x4bf   :  { %v1634_v37 = vpop.f32.mrb[4].mxu0 }
 0x4c0   :  { %v676_v38 = vmul.f32 0.35355338, %v1634_v37  ;;  %v666_v39 = vpop.f32.mrb[5].mxu0 }
 0x4c1   :  { %v675_v40 = vmul.f32 0.35355338, %v666_v39 }
 0x4c2   :  { %v678_v41 = vadd.f32 %v676_v38, %v2106_v26 }
 0x4c3   :  { %v677_v42 = vadd.f32 %v675_v40, %v2108_v29 }
 0x4c4   :  { %v682_v43 = vsel %vm270_vm3, %v678_v41, -inf }
 0x4c5   :  { %683 = vmax.xlane.f32.xlu0 %v682_v43  ;;  %v679_v44 = vsel %vm270_vm3, %v677_v42, -inf  ;;  %v69_v43 = vld [vmem:[#allocation7 + $0x48] sm:$0xff] }
 0x4c6   :  { %680 = vmax.xlane.f32.xlu1 %v679_v44 }
 0x552   :  { %v684_v45 = vpop.xlane.xlu0 %683 }
 0x553   :  { %v686_v46 = vsub.f32 %v678_v41, %v684_v45  ;;  %v681_v47 = vpop.xlane.xlu1 %680  ;;  %v70_v45 = vld [vmem:[#allocation7 + $0x68] sm:$0xff] }
 0x554   :  { %v685_v48 = vsub.f32 %v677_v42, %v681_v47  ;;  %v68_v42 = vld [vmem:[#allocation7 + $0x28] sm:$0xff] }
 0x555   :  { %v689_v49 = vmul.f32 1.442695, %v686_v46  ;;  %v1741_v46 = vpack.c.bf16 %v70_v45, %v69_v43 }
 0x556   :  { %v687_v50 = vmul.f32 1.442695, %v685_v48 }
 0x557   :  { %1842 = vpow2.f32 %v689_v49 }
 0x558   :  { %1844 = vpow2.f32 %v687_v50 }
 0x561   :  { %v1843_v51 = vpop.eup %1842 }
 0x562   :  { %v1845_v52 = vpop.eup %1844  ;;  %v694_v53 = vsel %vm270_vm3, %v1843_v51, 0.0 }
 0x563   :  { %695 = vadd.xlane.f32.xlu1 %v694_v53  ;;  %v691_v54 = vsel %vm270_vm3, %v1845_v52, 0.0 }
 0x564   :  { %692 = vadd.xlane.f32.xlu0 %v691_v54 }
 0x574   :  { %1817 = vrot.lane.b32.xlu1 %v2083_v13, %s1986_s10 }
 0x578   :  { %788 = vrot.lane.b32.xlu1 %v2076_v12, %s1987_s11 }
 0x57a   :  { %1812 = vrot.lane.b32.xlu0 %v2083_v13, %s1988_s12 }
 0x57e   :  { %790 = vrot.lane.b32.xlu0 %v2074_v10, %s1987_s11 }
 0x5f0   :  { %v696_v55 = vpop.xlane.xlu1 %695 }
 0x5f1   :  { %1846 = vrcp.f32 %v696_v55  ;;  %v693_v56 = vpop.xlane.xlu0 %692 }
 0x5f2   :  { %1848 = vrcp.f32 %v693_v56 }
 0x5f4   :  { %v1818_v57 = vpop.permute.xlu1 %1817 }
 0x5f5   :  { %v1813_v58 = vpop.permute.xlu0 %1812  ;;  %v1820_v59 = vunpack.i.h.bf16 %v1818_v57  ;;  %v1819_v60 = vunpack.i.l.bf16 %v1818_v57 }
 0x5f6   :  { %v1815_v61 = vunpack.i.h.bf16 %v1813_v58  ;;  %v1814_v62 = vunpack.i.l.bf16 %v1813_v58 }
 0x5f7   :  { %v1727_v0 = vpack.c.bf16 %v1820_v59, %v1819_v60 }
 0x5f8   :  { %v1723_v63 = vpack.c.bf16 %v1815_v61, %v1814_v62  ;;  %v789_v3 = vpop.permute.xlu1 %788  ;;  %v1515_v61 = vld [vmem:[%s2243_s3 + $0x1] ss:$0 sm:$0xff] }
 0x5f9   :  { %v791_v4 = vpop.permute.xlu0 %790 }
 0x5fa   :  { %1724 = vmatprep.subr.bf16.mxu1 %v1723_v63 }
 0x5fb   :  { %v1847_v1 = vpop.eup %1846  ;;  %1726 = vmatpush3.bf16.msra.mxu1 %v1723_v63 }
 0x5fc   :  { %v1849_v12 = vpop.eup %1848  ;;  %1729 = vmatprep.subr.msk.bf16.mxu1 %vm2090_vm2, %v1727_v0  ;;  %v700_v2 = vmul.f32 %v1847_v1, %v1843_v51 }
 0x5fd   :  { %v699_v10 = vmul.f32 %v1849_v12, %v1845_v52 }
 0x5ff   :  { %1639 = vmatprep.mubr.msk.f32.mxu1 %vm270_vm3, %v699_v10 }
 0x600   :  { %1640 = vmatmul.mubr.msk.f32.vlgmr.msra.gmra.mrb[6].mxu1 %vm270_vm3, %v700_v2 }
 0x601   :  { %1646 = vmatprep.mubr.msk.f32.mxu1 %vm182_vm1, %v789_v3 }
 0x604   :  { %1732 = vmatpush3.bf16.xpose.msk.msra.mxu1 %vm2090_vm2, %v1727_v0 }
 0x60b   :  { %1647 = vmatmul.mubr.msk.f32.vlgmr.msra.gmra.mrb[8].mxu1 %vm182_vm1, %v791_v4 }
 0x6d3   :  { %v1641_v6 = vpop.f32.mrb[6].mxu1 }
 0x6d4   :  { %v779_v8 = vpop.f32.mrb[7].mxu1 }
 0x6de   :  { %v1648_v9 = vpop.f32.mrb[8].mxu1 }
 0x6df   :  { %v880_v11 = vmul.f32 0.35355338, %v1648_v9  ;;  %v870_v14 = vpop.f32.mrb[9].mxu1 }
 0x6e0   :  { %v879_v15 = vmul.f32 0.35355338, %v870_v14 }
 0x6e1   :  { %v882_v16 = vadd.f32 %v880_v11, %v2106_v26 }
 0x6e2   :  { %v881_v18 = vadd.f32 %v879_v15, %v2108_v29 }
 0x6e3   :  { %v886_v19 = vsel %vm270_vm3, %v882_v16, -inf }
 0x6e4   :  { %887 = vmax.xlane.f32.xlu0 %v886_v19  ;;  %v883_v20 = vsel %vm270_vm3, %v881_v18, -inf  ;;  %v73_v19 = vld [vmem:[#allocation7 + $0x50] sm:$0xff] }
 0x6e5   :  { %884 = vmax.xlane.f32.xlu1 %v883_v20  ;;  %v74_v20 = vld [vmem:[#allocation7 + $0x70] sm:$0xff] }
 0x771   :  { %v888_v17 = vpop.xlane.xlu0 %887 }
 0x772   :  { %v890_v21 = vsub.f32 %v882_v16, %v888_v17  ;;  %v885_v22 = vpop.xlane.xlu1 %884  ;;  %v72_v16 = vld [vmem:[#allocation7 + $0x30] sm:$0xff]  ;;  %v1749_v17 = vpack.c.bf16 %v74_v20, %v73_v19 }
 0x773   :  { %v889_v23 = vsub.f32 %v881_v18, %v885_v22 }
 0x774   :  { %v893_v24 = vmul.f32 1.442695, %v890_v21 }
 0x775   :  { %v891_v25 = vmul.f32 1.442695, %v889_v23 }
 0x776   :  { %1850 = vpow2.f32 %v893_v24 }
 0x777   :  { %1852 = vpow2.f32 %v891_v25 }
 0x780   :  { %v1851_v27 = vpop.eup %1850 }
 0x781   :  { %v1853_v28 = vpop.eup %1852  ;;  %v898_v26 = vsel %vm270_vm3, %v1851_v27, 0.0 }
 0x782   :  { %899 = vadd.xlane.f32.xlu1 %v898_v26  ;;  %v895_v29 = vsel %vm270_vm3, %v1853_v28, 0.0  ;;  %v1518_v26 = vld [vmem:[%s2243_s3 + $0x2] ss:$0 sm:$0xff] }
 0x783   :  { %896 = vadd.xlane.f32.xlu0 %v895_v29 }
 0x793   :  { %994 = vrot.lane.b32.xlu1 %v2143_v36, %s1975_s28 }
 0x797   :  { %996 = vrot.lane.b32.xlu1 %v2141_v35, %s1975_s28  ;;  %s1991_s28 = smov 24  }
 0x799   :  { %1822 = vrot.lane.b32.xlu0 %v2083_v13, %s1989_s1  ;;  %v67_v13 = vld [vmem:[#allocation7 + $0x8] sm:$0xff] }
 0x79a   :  { %v1737_v44 = vpack.c.bf16 %v68_v42, %v67_v13  ;;  %v77_v13 = vld [vmem:[#allocation7 + $0x58] sm:$0xff] }
 0x79b   :  { %1004 = vrot.lane.b32.xlu1 %v1641_v6, %s1990_s13  ;;  %v78_v42 = vld [vmem:[#allocation7 + $0x78] sm:$0xff] }
 0x79c   :  { %v1759_v43 = vpack.c.bf16 %v78_v42, %v77_v13 }
 0x79d   :  { %1002 = vrot.lane.b32.xlu0 %v779_v8, %s1990_s13 }
 0x80f   :  { %v900_v30 = vpop.xlane.xlu1 %899 }
 0x810   :  { %1854 = vrcp.f32 %v900_v30  ;;  %v897_v31 = vpop.xlane.xlu0 %896  ;;  %v1519_v30 = vld [vmem:[%s2243_s3 + $0x3] ss:$0 sm:$0xff] }
 0x811   :  { %1856 = vrcp.f32 %v897_v31 }
 0x813   :  { %v995_v49 = vpop.permute.xlu1 %994 }
 0x814   :  { %v1823_v32 = vpop.permute.xlu0 %1822  ;;  %v1016_v53 = vsel %vm182_vm1, %v2139_v34, %v995_v49 }
 0x815   :  { %v1825_v37 = vunpack.i.h.bf16 %v1823_v32  ;;  %v1824_v38 = vunpack.i.l.bf16 %v1823_v32 }
 0x817   :  { %v1733_v39 = vpack.c.bf16 %v1825_v37, %v1824_v38  ;;  %v997_v50 = vpop.permute.xlu1 %996 }
 0x818   :  { %v1003_v52 = vpop.permute.xlu0 %1002  ;;  %v1017_v55 = vsel %vm182_vm1, %v2137_v33, %v997_v50 }
 0x819   :  { %1734 = vmatprep.subr.bf16.mxu0 %v1733_v39  ;;  %v1018_v56 = vsel %vm270_vm3, %v1016_v53, %v1003_v52 }
 0x81a   :  { %v1855_v40 = vpop.eup %1854  ;;  %1736 = vmatpush3.bf16.msra.mxu0 %v1733_v39 }
 0x81b   :  { %v1857_v36 = vpop.eup %1856  ;;  %v904_v35 = vmul.f32 %v1855_v40, %v1851_v27  ;;  %1738 = vmatprep.subr.bf16.mxu0 %v1737_v44  ;;  %v1005_v51 = vpop.permute.xlu1 %1004 }
 0x81c   :  { %v903_v41 = vmul.f32 %v1857_v36, %v1853_v28  ;;  %v1019_v58 = vsel %vm270_vm3, %v1017_v55, %v1005_v51  ;;  %v75_v36 = vld [vmem:[#allocation7 + $0x18] sm:$0xff] }
 0x81e   :  { %1653 = vmatprep.mubr.msk.f32.mxu0 %vm270_vm3, %v903_v41  ;;  %v76_v41 = vld [vmem:[#allocation7 + $0x38] sm:$0xff] }
 0x81f   :  { %1654 = vmatmul.mubr.msk.f32.vlgmr.msra.gmra.mrb[6].mxu0 %vm270_vm3, %v904_v35  ;;  %v1753_v35 = vpack.c.bf16 %v76_v41, %v75_v36 }
 0x820   :  { %1740 = vmatpush3.bf16.msra.mxu0 %v1737_v44  ;;  %v1520_v44 = vld [vmem:[%s2243_s3 + $0x4] ss:$0 sm:$0xff] }
 0x821   :  { %1742 = vmatprep.subr.bf16.mxu0 %v1741_v46 }
 0x824   :  { %1744 = vmatpush3.bf16.msra.mxu0 %v1741_v46 }
 0x825   :  { %1755 = vmatprep.subr.msk.bf16.mxu0 %vm1754_vm6, %v1753_v35 }
 0x8f2   :  { %v1655_v47 = vpop.f32.mrb[6].mxu0 }
 0x8f3   :  { %1012 = vrot.lane.b32.xlu1 %v1655_v47, %s1991_s28  ;;  %v983_v48 = vpop.f32.mrb[7].mxu0 }
 0x8f4   :  { %1010 = vrot.lane.b32.xlu0 %v983_v48, %s1991_s28 }
 0x965   :  { %v1013_v54 = vpop.permute.xlu1 %1012 }
 0x966   :  { %v1011_v57 = vpop.permute.xlu0 %1010  ;;  %v1022_v60 = vsel %vm1020_vm4, %v1019_v58, %v1013_v54 }
 0x967   :  { %v1021_v59 = vsel %vm1020_vm4, %v1018_v56, %v1011_v57 }
 0x968   :  { %1664 = vmatprep.mubr.msk.f32.mxu0 %vm94_vm0, %v1021_v59 }
 0x969   :  { %1665 = vmatmul.mubr.msk.f32.vlgmr.msra.gmra.mrb[8].mxu0 %vm94_vm0, %v1022_v60 }
 0x96a   :  { %1758 = vmatpush3.bf16.xpose.msk.msra.mxu0 %vm1754_vm6, %v1753_v35 }
 0x96b   :  { %1761 = vmatprep.subr.msk.bf16.mxu0 %vm1754_vm6, %v1759_v43 }
 0x972   :  { %1764 = vmatpush3.bf16.xpose.msk.msra.mxu0 %vm1754_vm6, %v1759_v43 }
 0xa3c   :  { %v1666_v34 = vpop.f32.mrb[8].mxu0 }
 0xa3d   :  { %v1107_v62 = vadd.f32 %v1666_v34, %v1515_v61  ;;  %v1101_v63 = vpop.f32.mrb[9].mxu0 }
 0xa3e   :  { %v1102_v0 = vadd.f32 %v1515_v61, %v1101_v63 }
 0xa3f   :  { %v1111_v33 = vadd.f32 %v1107_v62, %v2067_v7 }
 0xa40   :  { %v1110_v1 = vadd.f32 %v1102_v0, %v2063_v5  ;;  %v71_v5 = vld [vmem:[#allocation7 + $0x10] sm:$0xff] }
 0xa41   :  { %v1115_v12 = vsel %vm94_vm0, %v1111_v33, 0.0  ;;  %v1745_v18 = vpack.c.bf16 %v72_v16, %v71_v5 }
 0xa42   :  { %1116 = vadd.xlane.f32.xlu1 %v1115_v12  ;;  %v1112_v10 = vsel %vm94_vm0, %v1110_v1, 0.0 }
 0xa43   :  { %1113 = vadd.xlane.f32.xlu0 %v1112_v10  ;;  %1746 = vmatprep.subr.bf16.mxu1 %v1745_v18 }
 0xa44   :  { %1748 = vmatpush3.bf16.msra.mxu1 %v1745_v18 }
 0xa45   :  { %1750 = vmatprep.subr.bf16.mxu1 %v1749_v17 }
 0xa48   :  { %1752 = vmatpush3.bf16.msra.mxu1 %v1749_v17 }
 0xacf   :  { %v1117_v2 = vpop.xlane.xlu1 %1116 }
 0xad0   :  { %v1120_v3 = vmul.f32 0.03125, %v1117_v2  ;;  %v1114_v4 = vpop.xlane.xlu0 %1113 }
 0xad1   :  { %v1119_v6 = vmul.f32 0.03125, %v1114_v4 }
 0xad2   :  { %v1122_v8 = vsub.f32 %v1111_v33, %v1120_v3 }
 0xad3   :  { %v1121_v9 = vsub.f32 %v1110_v1, %v1119_v6  ;;  %v1523_v1 = vld [vmem:[%s2243_s3 + $0x5] ss:$0 sm:$0xff] }
 0xad4   :  { %v1124_v15 = vmul.f32 %v1122_v8, %v1122_v8 }
 0xad5   :  { %v1123_v11 = vmul.f32 %v1121_v9, %v1121_v9 }
 0xad6   :  { %v1128_v7 = vsel %vm94_vm0, %v1124_v15, 0.0 }
 0xad7   :  { %v1125_v14 = vsel %vm94_vm0, %v1123_v11, 0.0 }
 0xad8   :  { %1126 = vadd.xlane.f32.xlu0 %v1125_v14 }
 0xadc   :  { %1129 = vadd.xlane.f32.xlu0 %v1128_v7 }
 0xb65   :  { %v1127_v21 = vpop.xlane.xlu0 %1126 }
 0xb66   :  { %v1131_v22 = vmul.f32 0.03125, %v1127_v21 }
 0xb68   :  { %v1133_v23 = vadd.f32 1e-12, %v1131_v22 }
 0xb69   :  { %v1130_v24 = vpop.xlane.xlu0 %1129 }
 0xb6a   :  { %1858 = vrsqrt.f32 %v1133_v23  ;;  %v1132_v25 = vmul.f32 0.03125, %v1130_v24 }
 0xb6c   :  { %v1134_v27 = vadd.f32 1e-12, %v1132_v25 }
 0xb6e   :  { %1860 = vrsqrt.f32 %v1134_v27 }
 0xb74   :  { %v1859_v28 = vpop.eup %1858 }
 0xb75   :  { %v1137_v29 = vmul.f32 %v1859_v28, %v1121_v9 }
 0xb77   :  { %v1145_v31 = vmul.f32 %v1518_v26, %v1137_v29 }
 0xb78   :  { %v1861_v32 = vpop.eup %1860 }
 0xb79   :  { %v1138_v37 = vmul.f32 %v1861_v32, %v1122_v8  ;;  %v1153_v38 = vadd.f32 %v1519_v30, %v1145_v31  ;;  %v1531_v31 = vld [vmem:[%s2243_s3 + $0x7] ss:$0 sm:$0xff] }
 0xb7b   :  { %v1146_v39 = vmul.f32 %v1518_v26, %v1138_v37  ;;  %1675 = vmatprep.mubr.msk.f32.mxu1 %vm94_vm0, %v1153_v38  ;;  %v1530_v26 = vld [vmem:[%s2243_s3 + $0x6] ss:$0 sm:$0xff] }
 0xb7d   :  { %v1154_v40 = vadd.f32 %v1519_v30, %v1146_v39 }
 0xb7f   :  { %1676 = vmatmul.mubr.msk.f32.vlgmr.msra.gmra.mrb[10].mxu1 %vm94_vm0, %v1154_v40 }
 0xc52   :  { %v1677_v45 = vpop.f32.mrb[10].mxu1 }
 0xc53   :  { %v1239_v46 = vadd.f32 %v1677_v45, %v1520_v44  ;;  %v1233_v47 = vpop.f32.mrb[11].mxu1 }
 0xc54   :  { %v1234_v48 = vadd.f32 %v1520_v44, %v1233_v47 }
 0xc55   :  { %v1243_v49 = vmul.f32 %v1239_v46, %v1239_v46 }
 0xc56   :  { %v1242_v50 = vmul.f32 %v1234_v48, %v1234_v48 }
 0xc57   :  { %v1245_v51 = vmul.f32 %v1243_v49, %v1239_v46 }
 0xc58   :  { %v1244_v52 = vmul.f32 %v1242_v50, %v1234_v48 }
 0xc59   :  { %v1247_v53 = vmul.f32 0.044715, %v1245_v51 }
 0xc5a   :  { %v1246_v54 = vmul.f32 0.044715, %v1244_v52 }
 0xc5b   :  { %v1249_v55 = vadd.f32 %v1247_v53, %v1239_v46 }
 0xc5c   :  { %v1248_v56 = vadd.f32 %v1246_v54, %v1234_v48 }
 0xc5d   :  { %v1251_v57 = vmul.f32 0.7978846, %v1249_v55 }
 0xc5e   :  { %v1250_v58 = vmul.f32 0.7978846, %v1248_v56 }
 0xc5f   :  { %1862 = vtanh.f32 %v1251_v57 }
 0xc60   :  { %1864 = vtanh.f32 %v1250_v58 }
 0xc69   :  { %v1863_v59 = vpop.eup %1862 }
 0xc6a   :  { %v1865_v60 = vpop.eup %1864  ;;  %v1255_v61 = vadd.f32 1.0, %v1863_v59 }
 0xc6b   :  { %v1254_v34 = vadd.f32 1.0, %v1865_v60 }
 0xc6c   :  { %v1257_v62 = vmul.f32 0.5, %v1255_v61 }
 0xc6d   :  { %v1256_v63 = vmul.f32 0.5, %v1254_v34 }
 0xc6e   :  { %v1259_v33 = vmul.f32 %v1257_v62, %v1239_v46 }
 0xc6f   :  { %v1258_v0 = vmul.f32 %v1256_v63, %v1234_v48 }
 0xc71   :  { %1686 = vmatprep.mubr.msk.f32.mxu0 %vm1266_vm5, %v1258_v0 }
 0xc72   :  { %1687 = vmatmul.mubr.msk.f32.vlgmr.msra.gmra.mrb[10].mxu0 %vm1266_vm5, %v1259_v33 }
 0xd45   :  { %v1688_v12 = vpop.f32.mrb[10].mxu0 }
 0xd46   :  { %v1357_v10 = vadd.f32 %v1688_v12, %v1523_v1  ;;  %v1351_v2 = vpop.f32.mrb[11].mxu0 }
 0xd47   :  { %v1352_v3 = vadd.f32 %v1523_v1, %v1351_v2 }
 0xd48   :  { %v1361_v4 = vadd.f32 %v1357_v10, %v1154_v40 }
 0xd49   :  { %v1360_v6 = vadd.f32 %v1352_v3, %v1153_v38  ;;  %v1532_v38 = vld [vmem:[%s2243_s3 + $0x8] ss:$0 sm:$0xff]  ;;  %s1992_s3 = smov [#allocation8]  }
 0xd4a   :  { %v1365_v8 = vsel %vm94_vm0, %v1361_v4, 0.0  ;;  %s1478_s29 = sshll.u32 %s1992_s3, 4  ;;  %s1479_s29 = int_to_ptr.vmem [resolvable:$true] %s1478_s29 }
 0xd4b   :  { %1366 = vadd.xlane.f32.xlu0 %v1365_v8  ;;  %v1362_v9 = vsel %vm94_vm0, %v1360_v6, 0.0  ;;  %s1944_s30 = scalar_lea.vmem %s1479_s29, 32  ;;  %p1949_p11 = scmp.lt.s32.totalorder %s1479_s29, %s1479_s29 }
 0xd4c   :  { %1363 = vadd.xlane.f32.xlu1 %v1362_v9  ;;  %p1945_p10 = scmp.ne.s32.totalorder %s1479_s29, %s1944_s30  ;;  %p1950_p12 = scmp.lt.s32.totalorder %s1944_s30, %s1944_s30 }
 0xd4e   :  { %p1951_p13 = por %p1950_p12, %p1949_p11 }
 0xd50   :  { %p1952_p0 = pnand %p1951_p13, %p1945_p10 }
 0xdd8   :  { %v1367_v11 = vpop.xlane.xlu0 %1366 }
 0xdd9   :  { %v1369_v14 = vmul.f32 0.03125, %v1367_v11  ;;  %v1364_v15 = vpop.xlane.xlu1 %1363 }
 0xdda   :  { %v1368_v7 = vmul.f32 0.03125, %v1364_v15 }
 0xddb   :  { %v1371_v5 = vsub.f32 %v1361_v4, %v1369_v14 }
 0xddc   :  { %v1370_v16 = vsub.f32 %v1360_v6, %v1368_v7 }
 0xddd   :  { %v1373_v18 = vmul.f32 %v1371_v5, %v1371_v5 }
 0xdde   :  { %v1372_v19 = vmul.f32 %v1370_v16, %v1370_v16 }
 0xddf   :  { %v1377_v20 = vsel %vm94_vm0, %v1373_v18, 0.0 }
 0xde0   :  { %1378 = vadd.xlane.f32.xlu0 %v1377_v20  ;;  %v1374_v17 = vsel %vm94_vm0, %v1372_v19, 0.0 }
 0xde1   :  { %1375 = vadd.xlane.f32.xlu1 %v1374_v17 }
 0xe6d   :  { %v1379_v21 = vpop.xlane.xlu0 %1378 }
 0xe6e   :  { %v1381_v22 = vmul.f32 0.03125, %v1379_v21  ;;  %v1376_v23 = vpop.xlane.xlu1 %1375 }
 0xe6f   :  { %v1380_v24 = vmul.f32 0.03125, %v1376_v23 }
 0xe70   :  { %v1383_v25 = vadd.f32 1e-12, %v1381_v22 }
 0xe71   :  { %v1382_v27 = vadd.f32 1e-12, %v1380_v24 }
 0xe72   :  { %1866 = vrsqrt.f32 %v1383_v25 }
 0xe73   :  { %1868 = vrsqrt.f32 %v1382_v27 }
 0xe7c   :  { %v1867_v28 = vpop.eup %1866 }
 0xe7d   :  { %v1869_v29 = vpop.eup %1868  ;;  %v1387_v30 = vmul.f32 %v1867_v28, %v1371_v5 }
 0xe7e   :  { %v1386_v32 = vmul.f32 %v1869_v29, %v1370_v16 }
 0xe7f   :  { %v1395_v37 = vmul.f32 %v1530_v26, %v1387_v30 }
 0xe80   :  { %v1394_v39 = vmul.f32 %v1530_v26, %v1386_v32 }
 0xe81   :  { %v1403_v40 = vadd.f32 %v1531_v31, %v1395_v37 }
 0xe82   :  { %v1402_v36 = vadd.f32 %v1531_v31, %v1394_v39 }
 0xe83   :  { %v1439_v41 = vmul.f32 %v1532_v38, %v1403_v40 }
 0xe84   :  { %v1410_v35 = vmul.f32 %v1532_v38, %v1402_v36 }
 0xe85   :  { %v1440_v13 = vsel %vm94_vm0, %v1439_v41, 0.0 }
 0xe86   :  { %1441 = vadd.xlane.f32.xlu0 %v1440_v13  ;;  %v1411_v42 = vsel %vm94_vm0, %v1410_v35, 0.0 }
 0xe87   :  { %1412 = vadd.xlane.f32.xlu1 %v1411_v42 }
 0xf13   :  { %v1442_v43 = vpop.xlane.xlu0 %1441 }
 0xf14   :  { %v1443_v44 = vrot.slane %v1442_v43, 4  ;;  %v1413_v45 = vpop.xlane.xlu1 %1412 }
 0xf15   :  { %v1414_v46 = vrot.slane %v1413_v45, 4 }
 0xf16   :  { %v1444_v47 = vmax.f32 %v1442_v43, %v1443_v44 }
 0xf17   :  { %v1415_v48 = vmax.f32 %v1413_v45, %v1414_v46 }
 0xf18   :  { %v1445_v49 = vrot.slane %v1444_v47, 2 }
 0xf19   :  { %v1416_v50 = vrot.slane %v1415_v48, 2 }
 0xf1a   :  { %v1446_v51 = vmax.f32 %v1444_v47, %v1445_v49 }
 0xf1b   :  { %v1417_v52 = vmax.f32 %v1415_v48, %v1416_v50 }
 0xf1c   :  { %v1447_v53 = vrot.slane %v1446_v51, 1 }
 0xf1d   :  { %v1418_v54 = vrot.slane %v1417_v52, 1 }
 0xf1e   :  { %v1448_v55 = vmax.f32 %v1446_v51, %v1447_v53 }
 0xf1f   :  { %v1419_v56 = vmax.f32 %v1417_v52, %v1418_v54 }
 0xf20   :  { %v1449_v57 = vsub.f32 %v1442_v43, %v1448_v55 }
 0xf21   :  { %v1420_v58 = vsub.f32 %v1413_v45, %v1419_v56 }
 0xf22   :  { %v1450_v59 = vmul.f32 1.442695, %v1449_v57 }
 0xf23   :  { %v1421_v60 = vmul.f32 1.442695, %v1420_v58 }
 0xf24   :  { %1870 = vpow2.f32 %v1450_v59 }
 0xf25   :  { %1872 = vpow2.f32 %v1421_v60 }
 0xf2e   :  { %v1871_v61 = vpop.eup %1870 }
 0xf2f   :  { %v1873_v34 = vpop.eup %1872  ;;  %v1452_v62 = vrot.slane %v1871_v61, 4 }
 0xf30   :  { %v1423_v63 = vrot.slane %v1873_v34, 4 }
 0xf31   :  { %v1453_v0 = vadd.f32 %v1871_v61, %v1452_v62 }
 0xf32   :  { %v1424_v33 = vadd.f32 %v1873_v34, %v1423_v63 }
 0xf33   :  { %v1454_v1 = vrot.slane %v1453_v0, 2 }
 0xf34   :  { %v1425_v12 = vrot.slane %v1424_v33, 2 }
 0xf35   :  { %v1455_v10 = vadd.f32 %v1454_v1, %v1453_v0 }
 0xf36   :  { %v1426_v2 = vadd.f32 %v1425_v12, %v1424_v33 }
 0xf37   :  { %v1456_v3 = vrot.slane %v1455_v10, 1 }
 0xf38   :  { %v1427_v4 = vrot.slane %v1426_v2, 1 }
 0xf39   :  { %v1457_v6 = vadd.f32 %v1456_v3, %v1455_v10 }
 0xf3a   :  { %v1428_v8 = vadd.f32 %v1427_v4, %v1426_v2 }
 0xf3b   :  { %1874 = vrcp.f32 %v1457_v6 }
 0xf3c   :  { %1876 = vrcp.f32 %v1428_v8 }
 0xf45   :  { %v1875_v9 = vpop.eup %1874 }
 0xf46   :  { %v1877_v11 = vpop.eup %1876  ;;  %v1459_v14 = vmul.f32 %v1875_v9, %v1871_v61 }
 0xf47   :  { %v1430_v15 = vmul.f32 %v1877_v11, %v1873_v34 }
 0xf48   :  { %v1460_v7 = vmul.f32 %v1459_v14, %v1403_v40 }
 0xf49   :  { %v1431_v5 = vmul.f32 %v1430_v15, %v1402_v36 }
 0xf4a   :  { %v1461_v16 = vsel %vm94_vm0, %v1460_v7, 0.0 }
 0xf4b   :  { %v1432_v18 = vsel %vm94_vm0, %v1431_v5, 0.0  ;;  %v1462_v19 = vrot.slane %v1461_v16, 4 }
 0xf4c   :  { %v1433_v20 = vrot.slane %v1432_v18, 4 }
 0xf4d   :  { %v1463_v17 = vadd.f32 %v1462_v19, %v1461_v16 }
 0xf4e   :  { %v1434_v21 = vadd.f32 %v1433_v20, %v1432_v18 }
 0xf4f   :  { %v1464_v22 = vrot.slane %v1463_v17, 2 }
 0xf50   :  { %v1435_v23 = vrot.slane %v1434_v21, 2 }
 0xf51   :  { %v1465_v24 = vadd.f32 %v1464_v22, %v1463_v17 }
 0xf52   :  { %v1436_v25 = vadd.f32 %v1435_v23, %v1434_v21 }
 0xf53   :  { %v1466_v27 = vrot.slane %v1465_v24, 1 }
 0xf54   :  { %v1437_v28 = vrot.slane %v1436_v25, 1 }
 0xf55   :  { %v1467_v26 = vadd.f32 %v1466_v27, %v1465_v24 }
 0xf56   :  { %v1438_v29 = vadd.f32 %v1437_v28, %v1436_v25 }
 0xf58   :  { %v1469_v30 = vsel %vm1468_vm7, %v1438_v29, %v1467_v26 }
 0xf59   :  { %1471 = vst.msk [vmem:[#allocation8] sm:$0x3] %vm1470_vm8, %v1469_v30 }
 0xf5a   :  { %1955 = shalt.err (!%p1952_p0)
}
 0xf5b   :  { %s1956_s7 = scalar_lea.hbm %s2244_s4, 32 }
 0xf5c   :  { %p1957_p1 = scmp.ne.s32.totalorder %s2244_s4, %s1956_s7  ;;  %p1960_p2 = scmp.lt.u32.totalorder %s1956_s7, %s2244_s4 }
 0xf5e   :  { %p1962_p3 = pnand %p1960_p2, %p1957_p1 }
 0xf60   :  { %1965 = shalt.err (!%p1962_p3)
}
 0xf61   :  { %1481 = dma.vmem_to_hbm [thread:$0]  %s1479_s29, 32, %s2244_s4, [#allocation4]  }
 0xf62   :  { %1970 = dma.done.wait [#allocation4], 32  }
 0xf63   :  { %1971 = vsyncadd [#allocation4], 4294967264 }
 0xf64   :  { %1485 = vsyncpa [#allocation3], 1 }
 0xf65   :  { %1486 = vsyncpa [#allocation6], 1 }
 0xf66   :  { %1487 = vsyncpa [#allocation4], 1 }

</bundles_post_ra>
